<compile_context>
chip_gen: v7x
topology: tpu7x:2x2x1
jax: 0.10.0
libtpu: 0.0.40
codegen_flags: <defaults>
</compile_context>

<pallas_src>
import jax
import jax.numpy as jnp
from jax.experimental import pallas as pl
from jax.experimental.pallas import tpu as pltpu

EPS = 1e-5
NEG_SLOPE = 0.01  # nn.LeakyReLU default


def _leaky_relu(x):
    return jnp.where(x >= 0, x, NEG_SLOPE * x)


def residual_block_kernel(x_ref, p_ref, out_ref):
    """Fused BN1->LeakyReLU->(id)->BN2->LeakyReLU->(id)->+x on a (tr, tc) tile.

    x_ref:   (tr, tc) tile of the (N*C, H*W) activations (rows = flattened (n, c)).
    p_ref:   (tr, 4)  folded per-row BN params, columns = [a1, b1, a2, b2] (f32).
    out_ref: (tr, tc)
    """
    x = x_ref[...]                       # f32 test path; bf16 promotes to f32 below
    p = p_ref[...]                       # (tr, 4)
    a1, b1, a2, b2 = p[:, 0:1], p[:, 1:2], p[:, 2:3], p[:, 3:4]  # each (tr, 1)

    out = _leaky_relu(x * a1 + b1)       # BN1 (folded) + LeakyReLU; SF_Block1 = id
    out = _leaky_relu(out * a2 + b2)     # BN2 (folded) + LeakyReLU; SF_Block2 = id
    out_ref[...] = (out + x).astype(out_ref.dtype)


def _fold_bn(gamma, beta, mean, var):
    a = gamma * jax.lax.rsqrt(var + EPS)
    b = beta - mean * a
    return a, b


def _largest_divisor_tile(extent, unit, cap):
    """Largest t with t % unit == 0, t | extent, t <= cap.  None if extent % unit != 0."""
    if extent % unit != 0:
        return None
    q = extent // unit
    best = unit
    d = 1
    while d * d <= q:
        if q % d == 0:
            for f in (d, q // d):
                t = f * unit
                if best < t <= cap:
                    best = t
        d += 1
    return best


def _pick_tiles(rows, cols, dtype):
    """Exact-divisor, lane-dense tiles; no padding needed by construction."""
    LANE = 128
    itemsize = jnp.dtype(dtype).itemsize
    SUB = {4: 8, 2: 16, 1: 32}.get(itemsize, 8)   # packed-sublane tile per dtype

    # ~1 MiB input tile: double-buffered in + out + params stays well under the
    # v5e 16 MiB scoped-VMEM default.  (Raise toward 2-4 MiB for v7x-only runs.)
    target_tile_bytes = 1 << 20

    tc = _largest_divisor_tile(cols, LANE, cap=2048)
    if tc is None:
        tc = cols  # full-extent last dim is exempt from the 128-divisibility rule

    budget_rows = max(SUB, (target_tile_bytes // (tc * itemsize)) // SUB * SUB)
    tr = _largest_divisor_tile(rows, SUB, cap=budget_rows)
    if tr is None:
        tr = rows  # full-extent second-to-last dim is exempt from the sublane rule

    # Give the parallel grid >= 2 (even) steps so both v7x TensorCores get balanced
    # work; splitting only when divisibility is preserved (free on v5e/v6e: 1 TC).
    if (rows // tr) * (cols // tc) < 2:
        if tc % (2 * LANE) == 0:
            tc //= 2
        elif tr % (2 * SUB) == 0:
            tr //= 2
    return tr, tc


@jax.jit
def residual_block(x_nchw, bn1, bn2):
    """x_nchw: (N, C, H, W).  bn1/bn2: tuples (gamma, beta, running_mean, running_var), each (C,)."""
    N, C, H, W = x_nchw.shape
    rows, cols = N * C, H * W

    # Fold each BN into per-channel scale/offset, replicate per (n, c) row, and pack
    # into one lane-contiguous (N*C, 4) plane: columns = [a1, b1, a2, b2].
    a1, b1 = _fold_bn(*[p.astype(jnp.float32) for p in bn1])
    a2, b2 = _fold_bn(*[p.astype(jnp.float32) for p in bn2])
    params = jnp.stack([jnp.tile(p, N) for p in (a1, b1, a2, b2)], axis=-1)  # (rows, 4)

    # Lane-dense flat view: no transpose, no pad — just a contiguous reshape.
    x_flat = x_nchw.reshape(rows, cols)

    tr, tc = _pick_tiles(rows, cols, x_flat.dtype)
    grid = (rows // tr, cols // tc)

    out_flat = pl.pallas_call(
        residual_block_kernel,
        out_shape=jax.ShapeDtypeStruct((rows, cols), x_flat.dtype),
        grid_spec=pltpu.PrefetchScalarGridSpec(
            num_scalar_prefetch=0,
            grid=grid,
            in_specs=[
                pl.BlockSpec((tr, tc), lambda i, j: (i, j)),
                # Single small params plane per row-tile; index constant along j so
                # the pipeline skips redundant re-fetches across column steps.
                pl.BlockSpec((tr, 4), lambda i, j: (i, 0)),
            ],
            out_specs=pl.BlockSpec((tr, tc), lambda i, j: (i, j)),
        ),
        compiler_params=pltpu.CompilerParams(
            dimension_semantics=("parallel", "parallel")),
        cost_estimate=pl.CostEstimate(
            flops=10 * rows * cols,
            transcendentals=0,
            bytes_accessed=2 * rows * cols * x_flat.dtype.itemsize + 4 * rows * 4),
    )(x_flat, params)

    return out_flat.reshape(N, C, H, W)


def reference(x_nchw, bn1, bn2):
    """Plain-JAX reference with identical semantics (unfolded BN, NCHW)."""
    def bn(x, g, b, m, v):
        g, b, m, v = [p.reshape(1, -1, 1, 1) for p in (g, b, m, v)]
        return (x - m) * jax.lax.rsqrt(v + EPS) * g + b

    out = bn(x_nchw, *bn1)
    out = jnp.where(out >= 0, out, NEG_SLOPE * out)
    out = bn(out, *bn2)
    out = jnp.where(out >= 0, out, NEG_SLOPE * out)
    return out + x_nchw


if __name__ == "__main__":
    key = jax.random.PRNGKey(0)
    N, C, H, W = 2, 4, 16, 16  # channels=4, H=W=16

    k_x, k_g1, k_b1, k_m1, k_v1, k_g2, k_b2, k_m2, k_v2 = jax.random.split(key, 9)
    x = jax.random.normal(k_x, (N, C, H, W), dtype=jnp.float32)

    # Deterministic synthetic BN parameters (gamma, beta, running_mean, running_var).
    bn1 = (1.0 + 0.1 * jax.random.normal(k_g1, (C,), jnp.float32),
           0.1 * jax.random.normal(k_b1, (C,), jnp.float32),
           0.1 * jax.random.normal(k_m1, (C,), jnp.float32),
           1.0 + 0.1 * jax.random.uniform(k_v1, (C,), jnp.float32))
    bn2 = (1.0 + 0.1 * jax.random.normal(k_g2, (C,), jnp.float32),
           0.1 * jax.random.normal(k_b2, (C,), jnp.float32),
           0.1 * jax.random.normal(k_m2, (C,), jnp.float32),
           1.0 + 0.1 * jax.random.uniform(k_v2, (C,), jnp.float32))

    ref = reference(x, bn1, bn2)
    out = jax.block_until_ready(residual_block(x, bn1, bn2))

    assert out.shape == x.shape and out.dtype == x.dtype
    assert jnp.allclose(out, ref, atol=1e-5, rtol=1e-5), "mismatch vs. reference"
    print("KERNEL_OK")
</pallas_src>

<mosaic_0001>
module attributes {stable_mosaic.version = 11 : i64} {
  func.func @residual_block_kernel(%arg0: i32, %arg1: i32, %arg2: memref<8x128xf32, #tpu.memory_space<vmem>>, %arg3: memref<8x4xf32, #tpu.memory_space<vmem>>, %arg4: memref<8x128xf32, #tpu.memory_space<vmem>>) attributes {dimension_semantics = [#tpu.dimension_semantics<parallel>, #tpu.dimension_semantics<parallel>], iteration_bounds = array<i64: 1, 2>, scalar_prefetch = 0 : i64, scratch_operands = 0 : i64, tpu.core_type = #tpu.core_type<tc>, window_params = [{transform_indices = @transform_0, window_bounds = array<i64: 8, 128>}, {transform_indices = @transform_1, window_bounds = array<i64: 8, 4>}, {transform_indices = @transform_2, window_bounds = array<i64: 8, 128>}]} {
    %c0 = arith.constant 0 : index
    %c0_0 = arith.constant 0 : index
    %0 = vector.load %arg2[%c0, %c0_0] : memref<8x128xf32, #tpu.memory_space<vmem>>, vector<8x128xf32>
    %c0_1 = arith.constant 0 : index
    %c0_2 = arith.constant 0 : index
    %1 = vector.load %arg3[%c0_1, %c0_2] : memref<8x4xf32, #tpu.memory_space<vmem>>, vector<8x4xf32>
    %2 = vector.extract_strided_slice %1 {offsets = [0, 0], sizes = [8, 1], strides = [1, 1]} : vector<8x4xf32> to vector<8x1xf32>
    %3 = vector.extract_strided_slice %1 {offsets = [0, 1], sizes = [8, 1], strides = [1, 1]} : vector<8x4xf32> to vector<8x1xf32>
    %4 = vector.extract_strided_slice %1 {offsets = [0, 2], sizes = [8, 1], strides = [1, 1]} : vector<8x4xf32> to vector<8x1xf32>
    %5 = vector.extract_strided_slice %1 {offsets = [0, 3], sizes = [8, 1], strides = [1, 1]} : vector<8x4xf32> to vector<8x1xf32>
    %6 = vector.broadcast %2 : vector<8x1xf32> to vector<8x128xf32>
    %7 = arith.mulf %0, %6 : vector<8x128xf32>
    %8 = vector.broadcast %3 : vector<8x1xf32> to vector<8x128xf32>
    %9 = arith.addf %7, %8 : vector<8x128xf32>
    %cst = arith.constant 0.000000e+00 : f32
    %10 = vector.broadcast %cst : f32 to vector<8x128xf32>
    %11 = arith.cmpf oge, %9, %10 : vector<8x128xf32>
    %cst_3 = arith.constant 0.00999999977 : f32
    %12 = vector.broadcast %cst_3 : f32 to vector<8x128xf32>
    %13 = arith.mulf %12, %9 : vector<8x128xf32>
    %14 = arith.select %11, %9, %13 : vector<8x128xi1>, vector<8x128xf32>
    %15 = vector.broadcast %4 : vector<8x1xf32> to vector<8x128xf32>
    %16 = arith.mulf %14, %15 : vector<8x128xf32>
    %17 = vector.broadcast %5 : vector<8x1xf32> to vector<8x128xf32>
    %18 = arith.addf %16, %17 : vector<8x128xf32>
    %cst_4 = arith.constant 0.000000e+00 : f32
    %19 = vector.broadcast %cst_4 : f32 to vector<8x128xf32>
    %20 = arith.cmpf oge, %18, %19 : vector<8x128xf32>
    %cst_5 = arith.constant 0.00999999977 : f32
    %21 = vector.broadcast %cst_5 : f32 to vector<8x128xf32>
    %22 = arith.mulf %21, %18 : vector<8x128xf32>
    %23 = arith.select %20, %18, %22 : vector<8x128xi1>, vector<8x128xf32>
    %24 = arith.addf %23, %0 : vector<8x128xf32>
    %c0_6 = arith.constant 0 : index
    %c0_7 = arith.constant 0 : index
    %25 = vector.load %arg4[%c0_6, %c0_7] : memref<8x128xf32, #tpu.memory_space<vmem>>, vector<8x128xf32>
    tpu.vector_store %arg4[%c0_6, %c0_7], %24 {strides = array<i32>} : memref<8x128xf32, #tpu.memory_space<vmem>>, vector<8x128xf32>,
    return
  }
  func.func @transform_0(%arg0: i32, %arg1: i32) -> (i32, i32) {
    %c0_i32 = arith.constant 0 : i32
    return %arg0, %arg1 : i32, i32
  }
  func.func @transform_1(%arg0: i32, %arg1: i32) -> (i32, i32) {
    %c0_i32 = arith.constant 0 : i32
    %c0_i32_0 = arith.constant 0 : i32
    return %arg0, %c0_i32 : i32, i32
  }
  func.func @transform_2(%arg0: i32, %arg1: i32) -> (i32, i32) {
    %c0_i32 = arith.constant 0 : i32
    return %arg0, %arg1 : i32, i32
  }
}

</mosaic_0001>

<bundles_post_ra>
// kernel: tile.27
= control target key start
LH: loop header
LB: loop body
LE: loop exit
PB: predicated region body
PF: predicated region fallthrough
CT: control target
= control target key end

     0   :  { %s22_s0 = inlined_call_operand.vmem [shape: f32[4], index: 0, kind: input, shape index: {}]   ;;  %s23_s1 = inlined_call_operand.vmem [shape: f32[2,4], index: 1, kind: output, shape index: {}]  }
   0x1   :  { %v4_v0 = vld [vmem:[%s22_s0] ss:$0 sm:$0xff] }
   0x2   :  { %5 = vst [vmem:[%s23_s1] sm:$0x3] %v4_v0 }

// kernel: tile.2
= control target key start
LH: loop header
LB: loop body
LE: loop exit
PB: predicated region body
PF: predicated region fallthrough
CT: control target
= control target key end

     0   :  { %s34_s8 = smov 125   ;;  %vm7_vm0 = vcmask 7168   ;;  %s35_s11 = smov 126   ;;  %s61_s0 = inlined_call_operand.vmem [shape: f32[2,4], index: 0, kind: input, shape index: {}]   ;;  %s62_s1 = inlined_call_operand.vmem [shape: f32[8,1], index: 1, kind: output, shape index: {}]  }
   0x1   :  { %v4_v0 = vld [vmem:[%s61_s0] sm:$0x3]  ;;  %s33_s0 = smov 127  }
   0x2   :  { %5 = vst [vmem:[#allocation0] sm:$0x3] %v4_v0 }
   0x9   :  { %v9_v1 = vld [vmem:[#allocation0] sm:$0x3]  }
   0xa   :  { %v21_v2 = vld [vmem:[#allocation0] sm:$0x3]   ;;  %10 = vrot.lane.b32.xlu0 %v9_v1, %s33_s0 }
   0xb   :  { %22 = vrot.lane.b32.xlu1 %v21_v2, %s34_s8  ;;  %v6_v3 = vld [vmem:[#allocation0] sm:$0x3]  }
   0xc   :  { %v15_v4 = vld [vmem:[#allocation0] sm:$0x3]   ;;  %8 = vst.msk [vmem:[%s62_s1] ss:$4 sm:$0x3] %vm7_vm0, %v6_v3  }
   0xe   :  { %16 = vrot.lane.b32.xlu0 %v15_v4, %s35_s11 }
  0x7c   :  { %v11_v5 = vpop.permute.xlu0 %10  }
  0x7d   :  { %v23_v6 = vpop.permute.xlu1 %22   ;;  %27 = vst.msk [vmem:[%s62_s1 + $0x1] ss:$4 sm:$0x3] %vm7_vm0, %v11_v5  }
  0x7e   :  { %29 = vst.msk [vmem:[%s62_s1 + $0x3] ss:$4 sm:$0x3] %vm7_vm0, %v23_v6  }
  0x80   :  { %v17_v7 = vpop.permute.xlu0 %16  }
  0x81   :  { %28 = vst.msk [vmem:[%s62_s1 + $0x2] ss:$4 sm:$0x3] %vm7_vm0, %v17_v7  }

// kernel: residual_block.1
= control target key start
LH: loop header
LB: loop body
LE: loop exit
PB: predicated region body
PF: predicated region fallthrough
CT: control target
= control target key end

     0   :  { %s408_s9 = smov 0   ;;  %s410_s10 = smov 0   ;;  %s444_s0 = inlined_call_operand.vmem [shape: f32[8,256], index: 0, kind: input, shape index: {}]   ;;  %s445_s1 = inlined_call_operand.vmem [shape: f32[8,4], index: 1, kind: input, shape index: {}]   ;;  %s446_s2 = inlined_call_operand.vmem [shape: f32[8,256], index: 2, kind: output, shape index: {}]  }
   0x1   :  { %s412_s11 = smov 0  }
   0x2 LB: > { %s21_s12 = sadd.s32 1, %s383_s10  ;;  %p327_p0 = scmp.ge.s32.totalorder %s387_s11, 1  ;;  %s387_s11 = sphi %s412_s11, %s12_s11   ;;  %s383_s10 = sphi %s410_s10, %s448_s10   ;;  %s379_s9 = sphi %s408_s9, %s447_s9  }
   0x3   : > { %p22_p1 = scmp.ge.s32.totalorder %s21_s12, 2  ;;  %p140_p2 = scmp.lt.s32.totalorder %s387_s11, 3 }
   0x5   : > { %s450_s12 = smov (%p22_p1, %s21_s12), 0  ;;  %p141_p3 = pnand %p327_p0, %p140_p2 }
   0x6   : > { %v193_v0 = vld [vmem:[%s445_s1] sm:$0xff] (!%p141_p3)  ;;  %v389_v1 = vmov (!%p141_p3), 0   ;;  %v390_v2 = vmov (!%p141_p3), 2   ;;  %v391_v3 = vmov (!%p141_p3), 1   ;;  %v392_v4 = vmov (!%p141_p3), 3   ;;  %p174_p4 = scmp.lt.s32.totalorder (!%p141_p3), %s379_s9, 1 }
   0x7   : > { %144 = sbr.rel (%p141_p3) target bundleno = 156 (0x9c), region = 28  ;;  %360 = vset.pattern.permute.xlu0 (!%p141_p3), %v389_v1  ;;  %362 = vset.pattern.permute.xlu1 (!%p141_p3), %v390_v2 }
   0x8   : > { %196 = vperm.xlu0 (!%p141_p3), %360, %v193_v0   ;;  %209 = vperm.xlu1 (!%p141_p3), %362, %v193_v0  }
   0xc   : > { %361 = vset.pattern.permute.xlu0 (!%p141_p3), %v391_v3  ;;  %363 = vset.pattern.permute.xlu1 (!%p141_p3), %v392_v4 }
   0xd   : > { %201 = vperm.xlu0 (!%p141_p3), %361, %v193_v0   ;;  %214 = vperm.xlu1 (!%p141_p3), %363, %v193_v0  }
   0xe   : > { %s452_s9 = smov (!%p174_p4, %s379_s9), 1 }
   0xf   : > { %s328_s15 = sshll.u32 %s452_s9, 3 }
  0x10   : > { %s179_s18 = scalar_lea.vmem %s444_s0, %s328_s15  ;;  %s191_s21 = scalar_lea.vmem %s446_s2, %s328_s15 }
  0x11   : > { %364 = vset.pattern.permute.xlu0 %v392_v4  ;;  %v192_v6 = vld [vmem:[%s179_s18] sm:$0xff] }
  0x87   : > { %v197_v5 = vpop.permute.xlu0 %196  ;;  %v210_v8 = vpop.permute.xlu1 %209 }
  0x88   : > { %v199_v7 = vmul.f32 %v197_v5, %v192_v6 }
  0x8c   : > { %v202_v9 = vpop.permute.xlu0 %201  ;;  %v215_v13 = vpop.permute.xlu1 %214 }
  0x8d   : > { %v204_v10 = vadd.f32 %v202_v9, %v199_v7 }
  0x8f   : > { %v206_v11 = vmul.f32 0.01, %v204_v10  ;;  %vm205_vm0 = vcmp.ge.f32.partialorder %v204_v10, 0.0 }
  0x91   : > { %v207_v12 = vsel %vm205_vm0, %v204_v10, %v206_v11 }
  0x92   : > { %v212_v14 = vmul.f32 %v210_v8, %v207_v12 }
  0x94   : > { %v217_v15 = vadd.f32 %v215_v13, %v212_v14 }
  0x96   : > { %vm218_vm1 = vcmp.ge.f32.partialorder %v217_v15, 0.0  ;;  %v219_v16 = vmul.f32 0.01, %v217_v15 }
  0x98   : > { %v220_v17 = vsel %vm218_vm1, %v217_v15, %v219_v16 }
  0x99   : > { %v221_v18 = vadd.f32 %v220_v17, %v192_v6 }
  0x9b   : > { %222 = vst [vmem:[%s191_s21] sm:$0xff] %v221_v18 }
  0x9c PF: > { %s12_s11 = sadd.s32 1, %s387_s11   ;;  %s447_s9 = smov %s383_s10 }
  0x9d   : > { %p9_p5 = scmp.ge.s32.totalorder %s12_s11, 4   ;;  %s448_s10 = smov %s450_s12 }
  0x9f   :  { %11 = sbr.rel (!%p9_p5) target bundleno = 2 (0x2), region = 61 }

</bundles_post_ra>
